<compile_context>
chip_gen: v7x
topology: tpu7x:2x2x1
jax: 0.10.0
libtpu: 0.0.40
codegen_flags: <defaults>
</compile_context>

<pallas_src>
import jax
import jax.numpy as jnp
from jax import lax
from jax.experimental import pallas as pl
from jax.experimental.pallas import tpu as pltpu


# ----------------------------------------------------------------------------
# Kernels
# ----------------------------------------------------------------------------
def _epilogue_and_store(y, params_ref, o_ref):
    """Shared f32 epilogue: BN affine + LeakyReLU(0.1) + nearest x2 upsample.

    y:          (TH*W, Cout) f32 1x1-conv output for the current row tile.
    params_ref: (2, Cout) f32 -- row 0 = BN scale, row 1 = BN shift.
    o_ref:      (1, TH, 2, W, 2*Cout) output tile; (H, 2, W, 2C) is
                bit-identical row-major to (2H, 2W, C).
    """
    _, TH, _, W, twoC = o_ref.shape
    params = params_ref[...]
    y = y * params[0:1, :] + params[1:2, :]        # BN affine (f32 epilogue)
    y = jnp.maximum(y, 0.1 * y)                    # LeakyReLU(0.1)
    # Width x2 as lane-axis duplication: out[..., b*Cout + c] == y[..., c].
    yw = jnp.concatenate([y, y], axis=-1)          # (TH*W, 2*Cout)
    yw = yw.reshape(TH, W, twoC).astype(o_ref.dtype)
    # Height x2: two dense slab stores (no 4x-sized intermediate).
    o_ref[0, :, 0, :, :] = yw
    o_ref[0, :, 1, :, :] = yw


def _upsample_kernel_nhwc(x_ref, w_ref, params_ref, o_ref):
    """NHWC input tile. x_ref: (1, TH, W, Cin), w_ref: (Cin, Cout)."""
    _, TH, W, Cin = x_ref.shape
    x = x_ref[0].astype(w_ref.dtype).reshape(TH * W, Cin)
    y = jnp.dot(x, w_ref[...], preferred_element_type=jnp.float32)
    _epilogue_and_store(y, params_ref, o_ref)


def _upsample_kernel_nchw(x_ref, w_ref, params_ref, o_ref):
    """Channels-first input tile (fused layout read).

    x_ref: (1, Cin, TH*W) -- block of the free (N, Cin, H*W) view of NCHW x.
    The MXU consumes the transposed LHS natively via dot_general contracting
    dim 0 of x with dim 0 of w; no separate in-kernel transpose / XLA pass.
    """
    x = x_ref[0].astype(w_ref.dtype)               # (Cin, TH*W)
    y = lax.dot_general(x, w_ref[...],
                        dimension_numbers=(((0,), (0,)), ((), ())),
                        preferred_element_type=jnp.float32)  # (TH*W, Cout)
    _epilogue_and_store(y, params_ref, o_ref)


# ----------------------------------------------------------------------------
# Host-side helpers
# ----------------------------------------------------------------------------
def _fold_bn(conv_w, bn_gamma, bn_beta, bn_mean, bn_var, eps, compute_dtype):
    """Return (w, params): w (Cin, Cout) compute-dtype, params (2, Cout) f32."""
    Cout, Cin = conv_w.shape[0], conv_w.shape[1]
    w = conv_w.reshape(Cout, Cin).T.astype(compute_dtype)            # (Cin, Cout)
    scale = (bn_gamma / jnp.sqrt(bn_var + eps)).astype(jnp.float32)  # (Cout,)
    shift = (bn_beta - bn_mean * scale).astype(jnp.float32)          # (Cout,)
    params = jnp.stack([scale, shift], axis=0)                       # (2, Cout)
    return w, params


def _pick_tile_h(N, H, W, Cin, Cout, in_itemsize, out_itemsize,
                 budget_bytes=3 << 20, min_grid_steps=4,
                 require_lane_128=False):
    """Pick a row tile TH.

    * TH divides H and the (in + out) block fits budget_bytes (double
      buffering keeps the pipeline comfortably under the default scoped VMEM
      limits on v5e/v6e and v7x's 64 MiB).
    * Prefer TH small enough that the grid has >= min_grid_steps steps so
      v7x's two TensorCores both get work.
    * require_lane_128 (channels-first path): the flattened block width TH*W
      must be a multiple of 128 unless TH == H (full-dim block is exempt).
    * Falls back to the smallest valid TH if nothing fits the budget
      (correctness over budget).
    """
    def valid(th):
        if H % th:
            return False
        if require_lane_128 and th != H and (th * W) % 128 != 0:
            return False
        return True

    def block_bytes(th):
        return (th * W * Cin * in_itemsize
                + th * 2 * W * 2 * Cout * out_itemsize)

    cands = [th for th in range(1, H + 1) if valid(th)]
    in_budget = [th for th in cands if block_bytes(th) <= budget_bytes]
    pool = in_budget if in_budget else cands[:1]
    balanced = [th for th in pool if N * (H // th) >= min_grid_steps]
    pool = balanced if balanced else pool
    return max(pool)


# ----------------------------------------------------------------------------
# Forward passes
# ----------------------------------------------------------------------------
def upsample_forward_nhwc(x_nhwc, conv_w, bn_gamma, bn_beta, bn_mean, bn_var,
                          eps=1e-5, compute_dtype=jnp.bfloat16,
                          out_dtype=jnp.bfloat16, tile_h=None):
    """NHWC-native path (recommended). x_nhwc: (N, H, W, Cin).

    Returns (N, 2H, 2W, Cout) in out_dtype (default bf16; use jnp.float32 to
    match the PyTorch output dtype exactly).
    """
    N, H, W, Cin = x_nhwc.shape
    Cout = conv_w.shape[0]
    w, params = _fold_bn(conv_w, bn_gamma, bn_beta, bn_mean, bn_var, eps,
                         compute_dtype)

    if tile_h is None:
        tile_h = _pick_tile_h(N, H, W, Cin, Cout,
                              jnp.dtype(x_nhwc.dtype).itemsize,
                              jnp.dtype(out_dtype).itemsize)
    assert H % tile_h == 0, (H, tile_h)
    grid = (N, H // tile_h)

    out5 = pl.pallas_call(
        _upsample_kernel_nhwc,
        out_shape=jax.ShapeDtypeStruct((N, H, 2, W, 2 * Cout), out_dtype),
        grid=grid,
        in_specs=[
            pl.BlockSpec((1, tile_h, W, Cin), lambda n, h: (n, h, 0, 0)),
            pl.BlockSpec((Cin, Cout), lambda n, h: (0, 0)),
            pl.BlockSpec((2, Cout), lambda n, h: (0, 0)),
        ],
        out_specs=pl.BlockSpec((1, tile_h, 2, W, 2 * Cout),
                               lambda n, h: (n, h, 0, 0, 0)),
        compiler_params=pltpu.CompilerParams(
            dimension_semantics=("parallel", "parallel")),
    )(x_nhwc, w, params)

    # (N, H, 2, W, 2C) is bit-identical row-major to (N, 2H, 2W, C): free reshape.
    return out5.reshape(N, 2 * H, 2 * W, Cout)


def upsample_forward(x_nchw, conv_w, bn_gamma, bn_beta, bn_mean, bn_var,
                     eps=1e-5, compute_dtype=jnp.bfloat16,
                     out_dtype=jnp.bfloat16, tile_h=None):
    """PyTorch-interface (NCHW) wrapper: x_nchw (N, Cin, H, W) -> (N, Cout, 2H, 2W).

    The NCHW input read is fused into the kernel (no standalone XLA transpose
    of the input).  The output transpose back to NCHW is interface glue only;
    NHWC models should call upsample_forward_nhwc directly.
    """
    N, Cin, H, W = x_nchw.shape
    Cout = conv_w.shape[0]
    w, params = _fold_bn(conv_w, bn_gamma, bn_beta, bn_mean, bn_var, eps,
                         compute_dtype)

    if tile_h is None:
        tile_h = _pick_tile_h(N, H, W, Cin, Cout,
                              jnp.dtype(x_nchw.dtype).itemsize,
                              jnp.dtype(out_dtype).itemsize,
                              require_lane_128=True)
    assert H % tile_h == 0, (H, tile_h)
    assert tile_h == H or (tile_h * W) % 128 == 0, (tile_h, W)
    grid = (N, H // tile_h)
    thw = tile_h * W

    # Merging the two minor dims of a contiguous NCHW array is a free bitcast.
    x_flat = x_nchw.reshape(N, Cin, H * W)

    out5 = pl.pallas_call(
        _upsample_kernel_nchw,
        out_shape=jax.ShapeDtypeStruct((N, H, 2, W, 2 * Cout), out_dtype),
        grid=grid,
        in_specs=[
            pl.BlockSpec((1, Cin, thw), lambda n, h: (n, 0, h)),
            pl.BlockSpec((Cin, Cout), lambda n, h: (0, 0)),
            pl.BlockSpec((2, Cout), lambda n, h: (0, 0)),
        ],
        out_specs=pl.BlockSpec((1, tile_h, 2, W, 2 * Cout),
                               lambda n, h: (n, h, 0, 0, 0)),
        compiler_params=pltpu.CompilerParams(
            dimension_semantics=("parallel", "parallel")),
    )(x_flat, w, params)

    out_nhwc = out5.reshape(N, 2 * H, 2 * W, Cout)       # free reshape
    return jnp.transpose(out_nhwc, (0, 3, 1, 2))          # NCHW interface glue


# ----------------------------------------------------------------------------
# Pure-JAX reference (mirrors the PyTorch module, f32)
# ----------------------------------------------------------------------------
def _reference(x_nchw, conv_w, gamma, beta, mean, var, eps=1e-5):
    Cout, Cin = conv_w.shape[0], conv_w.shape[1]
    w = conv_w.reshape(Cout, Cin)
    y = jnp.einsum("nchw,oc->nohw", x_nchw, w)
    scale = gamma / jnp.sqrt(var + eps)
    shift = beta - mean * scale
    y = y * scale[None, :, None, None] + shift[None, :, None, None]
    y = jnp.where(y > 0, y, 0.1 * y)
    y = jnp.repeat(jnp.repeat(y, 2, axis=2), 2, axis=3)
    return y


if __name__ == "__main__":
    key = jax.random.PRNGKey(0)
    k_x, k_w, k_g, k_b, k_m, k_v = jax.random.split(key, 6)

    N, Cin, Cout, H, W = 2, 4, 8, 16, 16

    x = jax.random.normal(k_x, (N, Cin, H, W), dtype=jnp.float32)
    conv_w = jax.random.normal(k_w, (Cout, Cin, 1, 1), dtype=jnp.float32) * 0.1
    bn_gamma = 1.0 + 0.1 * jax.random.normal(k_g, (Cout,), dtype=jnp.float32)
    bn_beta = 0.1 * jax.random.normal(k_b, (Cout,), dtype=jnp.float32)
    bn_mean = 0.1 * jax.random.normal(k_m, (Cout,), dtype=jnp.float32)
    bn_var = jnp.abs(1.0 + 0.1 * jax.random.normal(k_v, (Cout,), dtype=jnp.float32))

    ref = _reference(x, conv_w, bn_gamma, bn_beta, bn_mean, bn_var)

    # NCHW (PyTorch-interface) path: fused channels-first read, bf16 output.
    # Tile picker chooses TH=8 -> grid (2, 2), TH*W = 128 (lane-aligned block).
    out = upsample_forward(x, conv_w, bn_gamma, bn_beta, bn_mean, bn_var)
    out = jax.block_until_ready(out)
    assert out.shape == (N, Cout, 2 * H, 2 * W), out.shape
    err = float(jnp.max(jnp.abs(out.astype(jnp.float32) - ref)))
    # bf16 inputs/weights/output -> loosened tolerance vs the f32 reference.
    assert jnp.allclose(out.astype(jnp.float32), ref, rtol=5e-2, atol=5e-2), (
        f"NCHW path mismatch vs reference: max abs err = {err}")

    # NHWC-native path (what an NHWC model should call; skips interface transposes).
    x_nhwc = jnp.transpose(x, (0, 2, 3, 1))
    out_nhwc = upsample_forward_nhwc(x_nhwc, conv_w, bn_gamma, bn_beta,
                                     bn_mean, bn_var)
    out_nhwc = jax.block_until_ready(out_nhwc)
    ref_nhwc = jnp.transpose(ref, (0, 2, 3, 1))
    assert out_nhwc.shape == (N, 2 * H, 2 * W, Cout), out_nhwc.shape
    err2 = float(jnp.max(jnp.abs(out_nhwc.astype(jnp.float32) - ref_nhwc)))
    assert jnp.allclose(out_nhwc.astype(jnp.float32), ref_nhwc,
                        rtol=5e-2, atol=5e-2), (
        f"NHWC path mismatch vs reference: max abs err = {err2}")

    print("KERNEL_OK")
</pallas_src>

<mosaic_0001>
module attributes {stable_mosaic.version = 11 : i64} {
  func.func @_upsample_kernel_nchw(%arg0: i32, %arg1: i32, %arg2: memref<1x4x128xf32, #tpu.memory_space<vmem>>, %arg3: memref<4x8xbf16, #tpu.memory_space<vmem>>, %arg4: memref<2x8xf32, #tpu.memory_space<vmem>>, %arg5: memref<1x8x2x16x16xbf16, #tpu.memory_space<vmem>>) attributes {dimension_semantics = [#tpu.dimension_semantics<parallel>, #tpu.dimension_semantics<parallel>], iteration_bounds = array<i64: 2, 2>, scalar_prefetch = 0 : i64, scratch_operands = 0 : i64, tpu.core_type = #tpu.core_type<tc>, window_params = [{transform_indices = @transform_0, window_bounds = array<i64: 1, 4, 128>}, {pipeline_mode = #tpu.pipeline_mode<synchronous>, transform_indices = @transform_1, window_bounds = array<i64: 4, 8>}, {pipeline_mode = #tpu.pipeline_mode<synchronous>, transform_indices = @transform_2, window_bounds = array<i64: 2, 8>}, {transform_indices = @transform_3, window_bounds = array<i64: 1, 8, 2, 16, 16>}]} {
    %c0 = arith.constant 0 : index
    %c0_0 = arith.constant 0 : index
    %c0_1 = arith.constant 0 : index
    %0 = vector.load %arg2[%c0, %c0_0, %c0_1] : memref<1x4x128xf32, #tpu.memory_space<vmem>>, vector<1x4x128xf32>
    %1 = vector.shape_cast %0 : vector<1x4x128xf32> to vector<4x128xf32>
    %2 = arith.truncf %1 : vector<4x128xf32> to vector<4x128xbf16>
    %c0_2 = arith.constant 0 : index
    %c0_3 = arith.constant 0 : index
    %3 = vector.load %arg3[%c0_2, %c0_3] : memref<4x8xbf16, #tpu.memory_space<vmem>>, vector<4x8xbf16>
    %cst = arith.constant dense<0.000000e+00> : vector<128x8xf32>
    %4 = tpu.matmul %2, %3, %cst {dimension_numbers = #tpu.dot_dimension_numbers<[0], [0], [1], [1], [0, 1, 1, 1], [], []>} : vector<4x128xbf16>, vector<4x8xbf16>, vector<128x8xf32> -> vector<128x8xf32>
    %c0_4 = arith.constant 0 : index
    %c0_5 = arith.constant 0 : index
    %5 = vector.load %arg4[%c0_4, %c0_5] : memref<2x8xf32, #tpu.memory_space<vmem>>, vector<2x8xf32>
    %6 = vector.extract_strided_slice %5 {offsets = [0, 0], sizes = [1, 8], strides = [1, 1]} : vector<2x8xf32> to vector<1x8xf32>
    %7 = vector.broadcast %6 : vector<1x8xf32> to vector<128x8xf32>
    %8 = arith.mulf %4, %7 : vector<128x8xf32>
    %9 = vector.extract_strided_slice %5 {offsets = [1, 0], sizes = [1, 8], strides = [1, 1]} : vector<2x8xf32> to vector<1x8xf32>
    %10 = vector.broadcast %9 : vector<1x8xf32> to vector<128x8xf32>
    %11 = arith.addf %8, %10 : vector<128x8xf32>
    %cst_6 = arith.constant 1.000000e-01 : f32
    %12 = vector.broadcast %cst_6 : f32 to vector<128x8xf32>
    %13 = arith.mulf %12, %11 : vector<128x8xf32>
    %14 = arith.maximumf %11, %13 : vector<128x8xf32>
    %15 = tpu.concatenate %14, %14 in 1 : vector<128x8xf32>, vector<128x8xf32> -> vector<128x16xf32>
    %16 = vector.shape_cast %15 : vector<128x16xf32> to vector<8x16x16xf32>
    %17 = arith.truncf %16 : vector<8x16x16xf32> to vector<8x16x16xbf16>
    %c0_7 = arith.constant 0 : index
    %c0_8 = arith.constant 0 : index
    %c0_9 = arith.constant 0 : index
    %c0_10 = arith.constant 0 : index
    %c0_11 = arith.constant 0 : index
    %18 = vector.load %arg5[%c0_7, %c0_8, %c0_9, %c0_10, %c0_11] : memref<1x8x2x16x16xbf16, #tpu.memory_space<vmem>>, vector<1x8x1x16x16xbf16>
    %19 = vector.shape_cast %18 : vector<1x8x1x16x16xbf16> to vector<8x16x16xbf16>
    %20 = vector.shape_cast %17 : vector<8x16x16xbf16> to vector<1x8x1x16x16xbf16>
    tpu.vector_store %arg5[%c0_7, %c0_8, %c0_9, %c0_10, %c0_11], %20 {strides = array<i32>} : memref<1x8x2x16x16xbf16, #tpu.memory_space<vmem>>, vector<1x8x1x16x16xbf16>,
    %c0_12 = arith.constant 0 : index
    %c0_13 = arith.constant 0 : index
    %c1 = arith.constant 1 : index
    %c0_14 = arith.constant 0 : index
    %c0_15 = arith.constant 0 : index
    %21 = vector.load %arg5[%c0_12, %c0_13, %c1, %c0_14, %c0_15] : memref<1x8x2x16x16xbf16, #tpu.memory_space<vmem>>, vector<1x8x1x16x16xbf16>
    %22 = vector.shape_cast %21 : vector<1x8x1x16x16xbf16> to vector<8x16x16xbf16>
    %23 = vector.shape_cast %17 : vector<8x16x16xbf16> to vector<1x8x1x16x16xbf16>
    tpu.vector_store %arg5[%c0_12, %c0_13, %c1, %c0_14, %c0_15], %23 {strides = array<i32>} : memref<1x8x2x16x16xbf16, #tpu.memory_space<vmem>>, vector<1x8x1x16x16xbf16>,
    return
  }
  func.func @transform_0(%arg0: i32, %arg1: i32) -> (i32, i32, i32) {
    %c0_i32 = arith.constant 0 : i32
    %c0_i32_0 = arith.constant 0 : i32
    return %arg0, %c0_i32, %arg1 : i32, i32, i32
  }
  func.func @transform_1(%arg0: i32, %arg1: i32) -> (i32, i32) {
    %c0_i32 = arith.constant 0 : i32
    %c0_i32_0 = arith.constant 0 : i32
    %c0_i32_1 = arith.constant 0 : i32
    return %c0_i32, %c0_i32_0 : i32, i32
  }
  func.func @transform_2(%arg0: i32, %arg1: i32) -> (i32, i32) {
    %c0_i32 = arith.constant 0 : i32
    %c0_i32_0 = arith.constant 0 : i32
    %c0_i32_1 = arith.constant 0 : i32
    return %c0_i32, %c0_i32_0 : i32, i32
  }
  func.func @transform_3(%arg0: i32, %arg1: i32) -> (i32, i32, i32, i32, i32) {
    %c0_i32 = arith.constant 0 : i32
    %c0_i32_0 = arith.constant 0 : i32
    %c0_i32_1 = arith.constant 0 : i32
    %c0_i32_2 = arith.constant 0 : i32
    return %arg0, %arg1, %c0_i32, %c0_i32_0, %c0_i32_1 : i32, i32, i32, i32, i32
  }
}

</mosaic_0001>

<bundles_post_ra>
// kernel: tpu_custom_call.1
= control target key start
LH: loop header
LB: loop body
LE: loop exit
PB: predicated region body
PF: predicated region fallthrough
CT: control target
= control target key end

     0   :  { %8 = vsyncpa [#allocation3], 0  ;;  %s1493_s0 = inlined_call_operand.hbm [shape: f32[2,4,256], index: 0, kind: input, shape index: {}]   ;;  %s1494_s1 = inlined_call_operand.vmem [shape: bf16[4,8], index: 1, kind: input, shape index: {}]   ;;  %s1495_s2 = inlined_call_operand.vmem [shape: f32[2,8], index: 2, kind: input, shape index: {}]   ;;  %s1496_s3 = inlined_call_operand.hbm [shape: bf16[2,16,2,16,16], index: 3, kind: output, shape index: {}]  }
   0x1   :  { %10 = vsyncpa [#allocation3 + $0x1], 0 }
   0x2   :  { %11 = vsyncpa [#allocation4], 0 }
   0x3   :  { %13 = vsyncpa [#allocation4 + $0x1], 0  ;;  %s1091_s12 = smov 0   ;;  %s1093_s13 = smov 0  }
   0x4   :  { %s1095_s14 = smov 0   ;;  %s1097_s15 = smov 0  }
   0x5   :  { %s1099_s16 = smov 0   ;;  %s1101_s17 = smov 0  }
   0x6   :  { %s1103_s18 = smov 0   ;;  %s1105_s19 = smov 0  }
   0x7 LB: > { %s709_s20 = sadd.s32 4294967295, %s1064_s19   ;;  %s710_s21 = sadd.s32 4294967294, %s1064_s19   ;;  %s1064_s19 = sphi %s1105_s19, %s19_s19   ;;  %s1060_s18 = sphi %s1103_s18, %s1513_s18   ;;  %s1056_s17 = sphi %s1101_s17, %s1512_s17   ;;  %s1052_s16 = sphi %s1099_s16, %s1511_s16   ;;  %s1048_s15 = sphi %s1097_s15, %s1510_s15   ;;  %s1044_s14 = sphi %s1095_s14, %s1509_s14   ;;  %s1040_s13 = sphi %s1093_s13, %s1508_s13   ;;  %s1036_s12 = sphi %s1091_s12, %s1507_s12  }
   0x8   : > { %s28_s22 = sadd.s32 1, %s1056_s17  ;;  %s31_s23 = sadd.s32 1, %s1060_s18 }
   0x9   : > { %p29_p0 = scmp.ge.s32.totalorder %s28_s22, 2  ;;  %s40_s24 = sadd.s32 1, %s1044_s14 }
   0xa   : > { %p47_p1 = scmp.ne.s32.totalorder %s1044_s14, %s1040_s13  ;;  %p48_p2 = scmp.eq.s32.totalorder %s1064_s19, 0 }
   0xb   : > { %s1515_s22 = smov (%p29_p0, %s28_s22), 0  ;;  %s1517_s23 = smov (!%p29_p0, %s31_s23), %s1060_s18 }
   0xc   : > { %s36_s25 = ssub.s32 %s1056_s17, %s1515_s22  ;;  %p1144_p3 = por %p48_p2, %p47_p1 }
   0xd   : > { %p33_p4 = scmp.ge.s32.totalorder %s1517_s23, 2  ;;  %p53_p5 = scmp.ne.s32.totalorder %s1040_s13, %s1036_s12 }
   0xe   : > { %p54_p6 = scmp.eq.s32.totalorder %s709_s20, 0  ;;  %p121_p7 = scmp.eq.s32.totalorder %s709_s20, 3 }
   0xf   : > { %s1519_s23 = smov (%p33_p4, %s1517_s23), 0  ;;  %p127_p10 = scmp.eq.s32.totalorder %s710_s21, 3 }
  0x10   : > { %p1152_p8 = por %p54_p6, %p53_p5  ;;  %p1156_p9 = por %p121_p7, %p47_p1 }
  0x11   : > { %s35_s29 = ssub.s32 %s1060_s18, %s1519_s23  ;;  %p1162_p12 = por %p127_p10, %p53_p5 }
  0x12   : > { %s1500_s28 = scalar_select %p1156_p9, 1, 0 }
  0x13   : > { %s37_s30 = sor.u32 %s36_s25, %s35_s29  ;;  %p826_p13 = scmp.lt.s32.totalorder %s1064_s19, 4 }
  0x14   : > { %p38_p11 = scmp.eq.s32.totalorder %s37_s30, 0  ;;  %s153_s5 = sand.u32 1, %s1044_s14  }
  0x15   : > { %s1501_s4 = scalar_select %p1162_p12, 1, 0 }
  0x16   : > { %s1169_s6 = scalar_select %p38_p11, %s1044_s14, %s40_s24  }
  0x17   : > { %s713_s7 = sshll.u32 %s153_s5, 2  ;;  %s714_s8 = sshll.u32 %s1060_s18, 1 }
  0x18   : > { %s162_s9 = sadd.s32 %s1056_s17, %s714_s8  ;;  %s157_s10 = scalar_lea.vmem [#allocation2], %s713_s7 }
  0x19   : > { %s166_s11 = sshll.u32 %s157_s10, 4  ;;  %s715_s20 = sshll.u32 %s162_s9, 6  ;;  %s1173_s11 = int_to_ptr.vmem [resolvable:$true] %s166_s11 }
  0x1a   : > { %s1178_s29 = scalar_lea.hbm %s1493_s0, %s715_s20  ;;  %p1182_p0 = pnand %p826_p13, %p1144_p3 }
  0x1b   : > { %s154_s30 = scalar_lea.sflag [#allocation3], %s153_s5  ;;  %s936_s7 = scalar_lea.hbm %s1178_s29, 64 }
  0x1c   : > { %p937_p4 = scmp.ne.s32.totalorder %s1178_s29, %s936_s7  ;;  %p938_p5 = pneg %p1182_p0 }
  0x1d   : > { %s941_s9 = scalar_lea.hbm %s1493_s0, 256  ;;  %p942_p3 = scmp.lt.u32.totalorder %s1178_s29, %s1493_s0 }
  0x1e   : > { %p939_p6 = pnand %p938_p5, %p937_p4  ;;  %p943_p10 = scmp.lt.u32.totalorder %s941_s9, %s936_s7 }
  0x1f   : > { %p945_p13 = scmp.lt.u32.totalorder %s936_s7, %s1178_s29 }
  0x20   : > { %p940_p7 = pneg %p939_p6  ;;  %p944_p11 = por %p943_p10, %p942_p3 }
  0x22   : > { %p946_p1 = por %p945_p13, %p944_p11 }
  0x24   : > { %p947_p2 = pnand %p946_p1, %p940_p7 }
  0x26   : > { %950 = shalt.err (!%p947_p2)
}
  0x27   : > { %s951_s5 = scalar_lea.vmem %s1173_s11, 64  ;;  %s1066_s21 = smov [#allocation2]  }
  0x28   : > { %p952_p4 = scmp.ne.s32.totalorder %s1173_s11, %s951_s5  ;;  %s956_s25 = sshll.u32 %s1066_s21, 4  ;;  %s957_s25 = int_to_ptr.vmem [resolvable:$false] %s956_s25 }
  0x29   : > { %s958_s26 = scalar_lea.vmem %s957_s25, 128  ;;  %p959_p9 = scmp.lt.s32.totalorder %s1173_s11, %s957_s25 }
  0x2a   : > { %p954_p6 = pnand %p952_p4, %p938_p5  ;;  %p960_p3 = scmp.lt.s32.totalorder %s958_s26, %s951_s5 }
  0x2c   : > { %p955_p12 = pneg %p954_p6  ;;  %p961_p10 = por %p960_p3, %p959_p9 }
  0x2e   : > { %p962_p11 = pnand %p961_p10, %p955_p12 }
  0x30   : > { %965 = shalt.err (!%p962_p11)
}
  0x31   : > { %821 = dma.hbm_to_vmem [thread:$0]  (!%p1182_p0), %s1178_s29, 64, %s1173_s11, %s154_s30  }
  0x32   : > { %p1503_p1 = scmp.lt.s32.totalorder %s1064_s19, 5  ;;  %p1504_p2 = scmp.ge.s32.totalorder %s1064_s19, 1 }
  0x34   : > { %p172_p5 = pnand %p1504_p2, %p1503_p1 }
  0x35   : > { %s1218_s7 = sand.u32 (!%p172_p5), 1, %s1040_s13  }
  0x36   : > { %175 = sbr.rel (%p172_p5) target bundleno = 562 (0x232), region = 32  ;;  %s717_s8 = sshll.u32 (!%p172_p5), %s1218_s7, 2 }
  0x37   : > { %s178_s9 = scalar_lea.sflag (!%p172_p5), [#allocation3], %s1218_s7  ;;  %s181_s10 = scalar_lea.vmem (!%p172_p5), [#allocation2], %s717_s8 }
  0x3d   : > { %1027 = dma.done.wait (%p1152_p8), %s178_s9, 64  }
  0x3e   : > { %1029 = vsyncadd (%p1152_p8), %s178_s9, 4294967232  ;;  %vm250_vm0 = vcmask 1041408   ;;  %v206_v0 = vld [vmem:[%s181_s10] sm:$0xf]  ;;  %vm225_vm1 = vcmask 31744   ;;  %v352_v12 = vlaneseq  ;;  %s1067_s30 = smov 8  }
  0x3f   : > { %v208_v1 = vld [vmem:[%s1494_s1] sm:$0x3]  ;;  %v207_v2 = vpack.c.bf16 %v206_v0, %v206_v0  ;;  %s718_s20 = sshll.u32 %s1218_s7, 7  ;;  %vm488_vm2 = vcmask 64512   ;;  %vm569_vm3 = vcmask 125952   ;;  %s782_s21 = sshll.u32 %s1048_s15, 5 }
  0x40   : > { %812 = vmatprep.subr.msk.bf16.mxu0 %vm250_vm0, %v208_v1  ;;  %v252_v3 = vsel %vm250_vm0, %v208_v1, 0  ;;  %813 = vmatprep.subr.msk.bf16.mxu1 %vm250_vm0, %v208_v1  ;;  %v353_v13 = vshrl.u32 %v352_v12, 7  ;;  %v351_v15 = vld [vmem:[%s1495_s2] sm:$0x3]  ;;  %s1341_s5 = scalar_lea.vmem [#allocation5], %s718_s20  ;;  %s762_s25 = sshll.u32 %s1052_s16, 6 }
  0x41   : > { %793 = vmatpush3.bf16.msra.mxu0 %v252_v3  ;;  %811 = vmatpush3.bf16.msra.mxu1 %v252_v3  ;;  %s617_s15 = sadd.s32 %s782_s21, %s762_s25  ;;  %s620_s26 = sshll.u32 %s1341_s5, 4  ;;  %s1431_s26 = int_to_ptr.vmem [resolvable:$true] %s620_s26 }
  0x42   : > { %209 = vxpose.xlu0.c.b16.start.end [1/1] (short) %v207_v2, 128  ;;  %v354_v14 = vsub.s32 0, %v353_v13  ;;  %v374_v16 = vsub.s32 1, %v353_v13  ;;  %s763_s16 = sshll.u32 %s617_s15, 6  ;;  %s604_s11 = scalar_lea.sflag [#allocation4], %s1218_s7 }
  0x43   : > { %s1429_s10 = scalar_lea.hbm %s1496_s3, %s763_s16  ;;  %s966_s29 = scalar_lea.vmem %s1431_s26, 2048 }
  0x44   : > { %v1240_v17 = vrot.slane %v351_v15, %v354_v14  ;;  %v1242_v18 = vrot.slane %v351_v15, %v374_v16  ;;  %p967_p8 = scmp.ne.s32.totalorder %s1431_s26, %s966_s29  ;;  %p1505_p9 = scmp.ne.s32.totalorder %s1500_s28, 0 }
  0x45   : > { %s1068_s27 = smov [#allocation5]  }
  0x46   : > { %p968_p12 = pnand %p967_p8, %p1505_p9  ;;  %s970_s24 = sshll.u32 %s1068_s27, 4  ;;  %s971_s24 = int_to_ptr.vmem [resolvable:$false] %s970_s24 }
  0x47   : > { %p973_p7 = scmp.lt.s32.totalorder %s1431_s26, %s971_s24 }
  0x48   : > { %p969_p0 = pneg %p968_p12 }
  0xa8   : > { %v217_v4 = vpop.trf.xlu0 }
  0xa9   : > { %794 = vmatprep.mubr.msk.bf16.mxu0 %vm225_vm1, %v217_v4 }
  0xac   : > { %v218_v5 = vpop.trf.xlu0 }
  0xad   : > { %795 = vmatmul.mubr.msk.bf16.vlgmr.msra.gmra.mrb[0].mxu0 %vm225_vm1, %v218_v5 }
  0xb0   : > { %v219_v6 = vpop.trf.xlu0 }
  0xb1   : > { %798 = vmatprep.mubr.msk.bf16.mxu0 %vm225_vm1, %v219_v6 }
  0xb4   : > { %v220_v7 = vpop.trf.xlu0 }
  0xb5   : > { %799 = vmatmul.mubr.msk.bf16.gmra.mrb[4].mxu0 %vm225_vm1, %v220_v7 }
  0xb8   : > { %v221_v8 = vpop.trf.xlu0 }
  0xb9   : > { %802 = vmatprep.mubr.msk.bf16.mxu1 %vm225_vm1, %v221_v8 }
  0xbc   : > { %v222_v9 = vpop.trf.xlu0 }
  0xbd   : > { %803 = vmatmul.mubr.msk.bf16.vlgmr.msra.gmra.mrb[0].mxu1 %vm225_vm1, %v222_v9 }
  0xc0   : > { %v223_v10 = vpop.trf.xlu0 }
  0xc1   : > { %806 = vmatprep.mubr.msk.bf16.mxu1 %vm225_vm1, %v223_v10 }
  0xc4   : > { %v224_v11 = vpop.trf.xlu0 }
  0xc5   : > { %807 = vmatmul.mubr.msk.bf16.gmra.mrb[4].mxu1 %vm225_vm1, %v224_v11 }
 0x180   : > { %v796_v19 = vpop.f32.mrb[0].mxu0 }
 0x181   : > { %v358_v20 = vmul.f32 %v796_v19, %v1240_v17  ;;  %v288_v21 = vpop.f32.mrb[1].mxu0 }
 0x182   : > { %v356_v22 = vmul.f32 %v1240_v17, %v288_v21  ;;  %v797_v23 = vpop.f32.mrb[2].mxu0 }
 0x183   : > { %v378_v24 = vadd.f32 %v1242_v18, %v358_v20  ;;  %v359_v25 = vmul.f32 %v797_v23, %v1240_v17  ;;  %v291_v26 = vpop.f32.mrb[3].mxu0 }
 0x184   : > { %v376_v27 = vadd.f32 %v1242_v18, %v356_v22  ;;  %v357_v28 = vmul.f32 %v1240_v17, %v291_v26 }
 0x185   : > { %v394_v29 = vmul.f32 0.1, %v378_v24  ;;  %v379_v30 = vadd.f32 %v1242_v18, %v359_v25 }
 0x186   : > { %v392_v31 = vmul.f32 0.1, %v376_v27  ;;  %v377_v32 = vadd.f32 %v1242_v18, %v357_v28 }
 0x187   : > { %v395_v33 = vmul.f32 0.1, %v379_v30  ;;  %v1253_v38 = vmax.f32 %v378_v24, %v394_v29 }
 0x188   : > { %v393_v34 = vmul.f32 0.1, %v377_v32  ;;  %v800_v35 = vpop.f32.mrb[4].mxu0  ;;  %v1257_v40 = vmax.f32 %v376_v27, %v392_v31 }
 0x189   : > { %v362_v36 = vmul.f32 %v800_v35, %v1240_v17  ;;  %v304_v37 = vpop.f32.mrb[5].mxu0  ;;  %v1255_v39 = vmax.f32 %v379_v30, %v395_v33 }
 0x18a   : > { %v1259_v41 = vmax.f32 %v377_v32, %v393_v34  ;;  %v360_v42 = vmul.f32 %v1240_v17, %v304_v37  ;;  %v801_v43 = vpop.f32.mrb[6].mxu0 }
 0x18b   : > { %v382_v44 = vadd.f32 %v1242_v18, %v362_v36  ;;  %v363_v45 = vmul.f32 %v801_v43, %v1240_v17  ;;  %v307_v46 = vpop.f32.mrb[7].mxu0  ;;  %v901_v47 = vpack.i.bf16 %v1255_v39, %v1253_v38 }
 0x18c   : > { %v361_v48 = vmul.f32 %v1240_v17, %v307_v46  ;;  %v896_v49 = vpack.i.bf16 %v1259_v41, %v1257_v40  ;;  %v380_v51 = vadd.f32 %v1242_v18, %v360_v42 }
 0x18d   : > { %v398_v50 = vmul.f32 0.1, %v382_v44  ;;  %v383_v52 = vadd.f32 %v1242_v18, %v363_v45  ;;  %902 = vrot.lane.b32.xlu1 %v901_v47, %s1067_s30 }
 0x18e   : > { %v381_v53 = vadd.f32 %v1242_v18, %v361_v48  ;;  %897 = vrot.lane.b32.xlu0 %v896_v49, %s1067_s30  ;;  %v396_v58 = vmul.f32 0.1, %v380_v51 }
 0x18f   : > { %v399_v54 = vmul.f32 0.1, %v383_v52  ;;  %v1274_v57 = vmax.f32 %v382_v44, %v398_v50 }
 0x190   : > { %v397_v55 = vmul.f32 0.1, %v381_v53  ;;  %v804_v56 = vpop.f32.mrb[0].mxu1  ;;  %v1287_v6 = vmax.f32 %v380_v51, %v396_v58 }
 0x191   : > { %v1276_v59 = vmax.f32 %v383_v52, %v399_v54  ;;  %v366_v60 = vmul.f32 %v804_v56, %v1240_v17  ;;  %v320_v61 = vpop.f32.mrb[1].mxu1 }
 0x192   : > { %v364_v62 = vmul.f32 %v1240_v17, %v320_v61  ;;  %v805_v63 = vpop.f32.mrb[2].mxu1  ;;  %v1280_v0 = vmax.f32 %v381_v53, %v397_v55 }
 0x193   : > { %v386_v1 = vadd.f32 %v1242_v18, %v366_v60  ;;  %v367_v2 = vmul.f32 %v805_v63, %v1240_v17  ;;  %v323_v3 = vpop.f32.mrb[3].mxu1  ;;  %v906_v4 = vpack.i.bf16 %v1276_v59, %v1274_v57 }
 0x194   : > { %v365_v5 = vmul.f32 %v1240_v17, %v323_v3  ;;  %v384_v8 = vadd.f32 %v1242_v18, %v364_v62  ;;  %v911_v12 = vpack.i.bf16 %v1280_v0, %v1287_v6 }
 0x195   : > { %v402_v7 = vmul.f32 0.1, %v386_v1  ;;  %v387_v9 = vadd.f32 %v1242_v18, %v367_v2  ;;  %907 = vrot.lane.b32.xlu1 %v906_v4, %s1067_s30 }
 0x196   : > { %v385_v10 = vadd.f32 %v1242_v18, %v365_v5  ;;  %v400_v16 = vmul.f32 0.1, %v384_v8 }
 0x197   : > { %v403_v11 = vmul.f32 0.1, %v387_v9  ;;  %v1295_v15 = vmax.f32 %v386_v1, %v402_v7 }
 0x198   : > { %v401_v13 = vmul.f32 0.1, %v385_v10  ;;  %v808_v14 = vpop.f32.mrb[4].mxu1  ;;  %v1309_v30 = vmax.f32 %v384_v8, %v400_v16 }
 0x199   : > { %v1297_v19 = vmax.f32 %v387_v9, %v403_v11  ;;  %912 = vrot.lane.b32.xlu1 %v911_v12, %s1067_s30  ;;  %v336_v20 = vpop.f32.mrb[5].mxu1  ;;  %v370_v21 = vmul.f32 %v808_v14, %v1240_v17 }
 0x19a   : > { %v368_v22 = vmul.f32 %v1240_v17, %v336_v20  ;;  %v809_v23 = vpop.f32.mrb[6].mxu1  ;;  %v1302_v24 = vmax.f32 %v385_v10, %v401_v13 }
 0x19b   : > { %v371_v25 = vmul.f32 %v809_v23, %v1240_v17  ;;  %v339_v26 = vpop.f32.mrb[7].mxu1  ;;  %v916_v27 = vpack.i.bf16 %v1297_v19, %v1295_v15  ;;  %v390_v32 = vadd.f32 %v1242_v18, %v370_v21 }
 0x19c   : > { %v388_v28 = vadd.f32 %v1242_v18, %v368_v22  ;;  %v369_v29 = vmul.f32 %v1240_v17, %v339_v26  ;;  %v921_v35 = vpack.i.bf16 %v1302_v24, %v1309_v30 }
 0x19d   : > { %v391_v31 = vadd.f32 %v1242_v18, %v371_v25  ;;  %917 = vrot.lane.b32.xlu1 %v916_v27, %s1067_s30  ;;  %v406_v17 = vmul.f32 0.1, %v390_v32 }
 0x19e   : > { %v404_v33 = vmul.f32 0.1, %v388_v28  ;;  %v389_v34 = vadd.f32 %v1242_v18, %v369_v29 }
 0x19f   : > { %v407_v36 = vmul.f32 0.1, %v391_v31  ;;  %v1326_v46 = vmax.f32 %v390_v32, %v406_v17 }
 0x1a0   : > { %v405_v37 = vmul.f32 0.1, %v389_v34  ;;  %v1318_v42 = vmax.f32 %v388_v28, %v404_v33 }
 0x1a1   : > { %922 = vrot.lane.b32.xlu1 %v921_v35, %s1067_s30  ;;  %v1322_v44 = vmax.f32 %v391_v31, %v407_v36 }
 0x1a2   : > { %v1320_v43 = vmax.f32 %v389_v34, %v405_v37 }
 0x1a3   : > { %v931_v18 = vpack.i.bf16 %v1322_v44, %v1326_v46 }
 0x1a4   : > { %v926_v45 = vpack.i.bf16 %v1320_v43, %v1318_v42 }
 0x1a6   : > { %927 = vrot.lane.b32.xlu1 %v926_v45, %s1067_s30 }
 0x1aa   : > { %932 = vrot.lane.b32.xlu1 %v931_v18, %s1067_s30  ;;  %s972_s30 = scalar_lea.vmem %s971_s24, 4096 }
 0x1ab   : > { %p974_p13 = scmp.lt.s32.totalorder %s972_s30, %s966_s29 }
 0x1ad   : > { %p975_p4 = por %p974_p13, %p973_p7 }
 0x1af   : > { %p976_p6 = pnand %p975_p4, %p969_p0 }
 0x1ff   : > { %v903_v47 = vpop.permute.xlu1 %902 }
 0x200   : > { %v905_v48 = vunpack.i.h.bf16 %v903_v47  ;;  %v904_v49 = vunpack.i.l.bf16 %v903_v47  ;;  %v898_v50 = vpop.permute.xlu0 %897 }
 0x201   : > { %v900_v51 = vunpack.i.h.bf16 %v898_v50  ;;  %v899_v52 = vunpack.i.l.bf16 %v898_v50 }
 0x202   : > { %v492_v53 = vsel %vm488_vm2, %v1255_v39, %v905_v48  ;;  %v491_v54 = vsel %vm488_vm2, %v1253_v38, %v904_v49 }
 0x203   : > { %v769_v55 = vpack.c.bf16 %v492_v53, %v492_v53  ;;  %v768_v56 = vpack.c.bf16 %v491_v54, %v491_v54  ;;  %v490_v58 = vsel %vm488_vm2, %v1259_v41, %v900_v51  ;;  %v489_v60 = vsel %vm488_vm2, %v1257_v40, %v899_v52 }
 0x204   : > { %v767_v61 = vpack.c.bf16 %v490_v58, %v490_v58  ;;  %v766_v62 = vpack.c.bf16 %v489_v60, %v489_v60 }
 0x205   : > { %573 = vst.msk [vmem:[%s1341_s5 + $0x14] sm:$0xf] %vm569_vm3, %v769_v55  ;;  %746 = vst.msk [vmem:[%s1341_s5 + $0x1c] sm:$0xf] %vm569_vm3, %v769_v55 }
 0x206   : > { %572 = vst.msk [vmem:[%s1341_s5 + $0x10] sm:$0xf] %vm569_vm3, %v768_v56  ;;  %745 = vst.msk [vmem:[%s1341_s5 + $0x18] sm:$0xf] %vm569_vm3, %v768_v56 }
 0x207   : > { %571 = vst.msk [vmem:[%s1341_s5 + $0x4] sm:$0xf] %vm569_vm3, %v767_v61  ;;  %744 = vst.msk [vmem:[%s1341_s5 + $0xc] sm:$0xf] %vm569_vm3, %v767_v61  ;;  %v908_v38 = vpop.permute.xlu1 %907 }
 0x208   : > { %570 = vst.msk [vmem:[%s1341_s5] sm:$0xf] %vm569_vm3, %v766_v62  ;;  %743 = vst.msk [vmem:[%s1341_s5 + $0x8] sm:$0xf] %vm569_vm3, %v766_v62  ;;  %v910_v39 = vunpack.i.h.bf16 %v908_v38  ;;  %v909_v40 = vunpack.i.l.bf16 %v908_v38 }
 0x20a   : > { %v496_v41 = vsel %vm488_vm2, %v1276_v59, %v910_v39  ;;  %v495_v63 = vsel %vm488_vm2, %v1274_v57, %v909_v40 }
 0x20b   : > { %v773_v1 = vpack.c.bf16 %v496_v41, %v496_v41  ;;  %v772_v2 = vpack.c.bf16 %v495_v63, %v495_v63  ;;  %v913_v3 = vpop.permute.xlu1 %912 }
 0x20c   : > { %v915_v4 = vunpack.i.h.bf16 %v913_v3  ;;  %v914_v5 = vunpack.i.l.bf16 %v913_v3 }
 0x20d   : > { %577 = vst.msk [vmem:[%s1341_s5 + $0x34] sm:$0xf] %vm569_vm3, %v773_v1  ;;  %750 = vst.msk [vmem:[%s1341_s5 + $0x3c] sm:$0xf] %vm569_vm3, %v773_v1 }
 0x20e   : > { %576 = vst.msk [vmem:[%s1341_s5 + $0x30] sm:$0xf] %vm569_vm3, %v772_v2  ;;  %749 = vst.msk [vmem:[%s1341_s5 + $0x38] sm:$0xf] %vm569_vm3, %v772_v2  ;;  %v494_v57 = vsel %vm488_vm2, %v1280_v0, %v915_v4  ;;  %v493_v59 = vsel %vm488_vm2, %v1287_v6, %v914_v5 }
 0x20f   : > { %v771_v7 = vpack.c.bf16 %v494_v57, %v494_v57  ;;  %v770_v8 = vpack.c.bf16 %v493_v59, %v493_v59  ;;  %v918_v9 = vpop.permute.xlu1 %917 }
 0x210   : > { %v920_v10 = vunpack.i.h.bf16 %v918_v9  ;;  %v919_v11 = vunpack.i.l.bf16 %v918_v9 }
 0x211   : > { %575 = vst.msk [vmem:[%s1341_s5 + $0x24] sm:$0xf] %vm569_vm3, %v771_v7  ;;  %748 = vst.msk [vmem:[%s1341_s5 + $0x2c] sm:$0xf] %vm569_vm3, %v771_v7 }
 0x212   : > { %574 = vst.msk [vmem:[%s1341_s5 + $0x20] sm:$0xf] %vm569_vm3, %v770_v8  ;;  %747 = vst.msk [vmem:[%s1341_s5 + $0x28] sm:$0xf] %vm569_vm3, %v770_v8  ;;  %v500_v0 = vsel %vm488_vm2, %v1297_v19, %v920_v10  ;;  %v499_v6 = vsel %vm488_vm2, %v1295_v15, %v919_v11 }
 0x213   : > { %v777_v12 = vpack.c.bf16 %v500_v0, %v500_v0  ;;  %v776_v13 = vpack.c.bf16 %v499_v6, %v499_v6  ;;  %v923_v14 = vpop.permute.xlu1 %922 }
 0x214   : > { %v925_v16 = vunpack.i.h.bf16 %v923_v14  ;;  %v924_v20 = vunpack.i.l.bf16 %v923_v14 }
 0x215   : > { %581 = vst.msk [vmem:[%s1341_s5 + $0x54] sm:$0xf] %vm569_vm3, %v777_v12  ;;  %754 = vst.msk [vmem:[%s1341_s5 + $0x5c] sm:$0xf] %vm569_vm3, %v777_v12 }
 0x216   : > { %580 = vst.msk [vmem:[%s1341_s5 + $0x50] sm:$0xf] %vm569_vm3, %v776_v13  ;;  %753 = vst.msk [vmem:[%s1341_s5 + $0x58] sm:$0xf] %vm569_vm3, %v776_v13  ;;  %v498_v15 = vsel %vm488_vm2, %v1302_v24, %v925_v16  ;;  %v497_v19 = vsel %vm488_vm2, %v1309_v30, %v924_v20 }
 0x217   : > { %v775_v21 = vpack.c.bf16 %v498_v15, %v498_v15  ;;  %v774_v22 = vpack.c.bf16 %v497_v19, %v497_v19 }
 0x218   : > { %v928_v23 = vpop.permute.xlu1 %927 }
 0x219   : > { %579 = vst.msk [vmem:[%s1341_s5 + $0x44] sm:$0xf] %vm569_vm3, %v775_v21  ;;  %752 = vst.msk [vmem:[%s1341_s5 + $0x4c] sm:$0xf] %vm569_vm3, %v775_v21  ;;  %v930_v24 = vunpack.i.h.bf16 %v928_v23  ;;  %v929_v25 = vunpack.i.l.bf16 %v928_v23 }
 0x21a   : > { %578 = vst.msk [vmem:[%s1341_s5 + $0x40] sm:$0xf] %vm569_vm3, %v774_v22  ;;  %751 = vst.msk [vmem:[%s1341_s5 + $0x48] sm:$0xf] %vm569_vm3, %v774_v22 }
 0x21b   : > { %v502_v26 = vsel %vm488_vm2, %v1320_v43, %v930_v24  ;;  %v501_v27 = vsel %vm488_vm2, %v1318_v42, %v929_v25 }
 0x21c   : > { %v779_v28 = vpack.c.bf16 %v502_v26, %v502_v26  ;;  %v778_v29 = vpack.c.bf16 %v501_v27, %v501_v27  ;;  %v933_v30 = vpop.permute.xlu1 %932 }
 0x21d   : > { %v935_v31 = vunpack.i.h.bf16 %v933_v30  ;;  %v934_v32 = vunpack.i.l.bf16 %v933_v30 }
 0x21e   : > { %583 = vst.msk [vmem:[%s1341_s5 + $0x64] sm:$0xf] %vm569_vm3, %v779_v28  ;;  %756 = vst.msk [vmem:[%s1341_s5 + $0x6c] sm:$0xf] %vm569_vm3, %v779_v28 }
 0x21f   : > { %582 = vst.msk [vmem:[%s1341_s5 + $0x60] sm:$0xf] %vm569_vm3, %v778_v29  ;;  %755 = vst.msk [vmem:[%s1341_s5 + $0x68] sm:$0xf] %vm569_vm3, %v778_v29  ;;  %v504_v33 = vsel %vm488_vm2, %v1322_v44, %v935_v31  ;;  %v503_v34 = vsel %vm488_vm2, %v1326_v46, %v934_v32 }
 0x220   : > { %v781_v35 = vpack.c.bf16 %v504_v33, %v504_v33  ;;  %v780_v36 = vpack.c.bf16 %v503_v34, %v503_v34 }
 0x222   : > { %585 = vst.msk [vmem:[%s1341_s5 + $0x74] sm:$0xf] %vm569_vm3, %v781_v35  ;;  %758 = vst.msk [vmem:[%s1341_s5 + $0x7c] sm:$0xf] %vm569_vm3, %v781_v35 }
 0x223   : > { %584 = vst.msk [vmem:[%s1341_s5 + $0x70] sm:$0xf] %vm569_vm3, %v780_v36  ;;  %757 = vst.msk [vmem:[%s1341_s5 + $0x78] sm:$0xf] %vm569_vm3, %v780_v36 }
 0x224   : > { %979 = shalt.err (!%p976_p6)
}
 0x225   : > { %s980_s20 = scalar_lea.hbm %s1429_s10, 2048  ;;  %s984_s25 = scalar_lea.hbm %s1496_s3, 8192 }
 0x226   : > { %p981_p3 = scmp.ne.s32.totalorder %s1429_s10, %s980_s20  ;;  %p985_p1 = scmp.lt.u32.totalorder %s1429_s10, %s1496_s3 }
 0x227   : > { %p986_p2 = scmp.lt.u32.totalorder %s984_s25, %s980_s20  ;;  %p988_p8 = scmp.lt.u32.totalorder %s980_s20, %s1429_s10 }
 0x228   : > { %p982_p10 = pnand %p981_p3, %p1505_p9 }
 0x229   : > { %p987_p5 = por %p986_p2, %p985_p1 }
 0x22a   : > { %p983_p11 = pneg %p982_p10 }
 0x22b   : > { %p989_p12 = por %p988_p8, %p987_p5 }
 0x22d   : > { %p990_p0 = pnand %p989_p12, %p983_p11 }
 0x22f   : > { %993 = shalt.err (!%p990_p0)
}
 0x230   : > { %s1069_s8 = smov 64   ;;  %s1070_s9 = smov 4  }
 0x231   : > { %816 = dma.vmem_to_hbm [thread:$0]  (%p1505_p9), %s1431_s26, 2048, %s1429_s10, %s604_s11, %s1069_s8, %s1069_s8, %s1070_s9  }
 0x232 PF: > { %p827_p7 = scmp.ge.s32.totalorder %s1064_s19, 2  ;;  %s635_s29 = sand.u32 1, %s1036_s12  }
 0x233   : > { %p1506_p13 = scmp.ne.s32.totalorder %s1501_s4, 0  ;;  %s636_s27 = scalar_lea.sflag [#allocation4], %s635_s29 }
 0x235   : > { %p823_p4 = pnand %p827_p7, %p1506_p13 }
 0x237   : > { %1031 = dma.done.wait (!%p823_p4), %s636_s27, 2048  }
 0x238   : > { %1033 = vsyncadd (!%p823_p4), %s636_s27, 4294965248  ;;  %s19_s19 = sadd.s32 1, %s1064_s19   ;;  %s1507_s12 = smov %s1040_s13 }
 0x239   : > { %p16_p6 = scmp.ge.s32.totalorder %s19_s19, 6   ;;  %s1508_s13 = smov %s1044_s14 }
 0x23a   : > { %s1509_s14 = smov %s1169_s6  ;;  %s1510_s15 = smov %s1056_s17 }
 0x23b   : > { %s1511_s16 = smov %s1060_s18  ;;  %s1512_s17 = smov %s1515_s22 }
 0x23c   : > { %s1513_s18 = smov %s1519_s23  ;;  %18 = sbr.rel (!%p16_p6) target bundleno = 7 (0x7), region = 78 }
 0x243   :  { %641 = vsyncpa [#allocation3], 1 }
 0x244   :  { %643 = vsyncpa [#allocation3 + $0x1], 1 }
 0x245   :  { %644 = vsyncpa [#allocation4], 1 }
 0x246   :  { %646 = vsyncpa [#allocation4 + $0x1], 1 }

</bundles_post_ra>
